<compile_context>
chip_gen: v7x
topology: tpu7x:2x2x1
jax: 0.10.0
libtpu: 0.0.40
codegen_flags: <defaults>
</compile_context>

<pallas_src>
import functools

import jax
import jax.numpy as jnp
from jax import lax
from jax.experimental import pallas as pl
from jax.experimental.pallas import tpu as pltpu

LANES = 128
EPS = 1e-7          # NaN guard for log(p) / log1p(-p) when p saturates to 0.0 / 1.0
NUM_SPLITS = 2      # outer "parallel" grid axis; uses both TCs on v7x, harmless on 1-TC chips


def _round_up(x, m):
    return ((x + m - 1) // m) * m


def _cdiv(a, b):
    return (a + b - 1) // b


def _sublane_multiple(dtype):
    # f32 -> 8, bf16 -> 16, int8/bool -> 32 (packed-dtype sublane tiling).
    return max(8, 32 // jnp.dtype(dtype).itemsize)


def _focal_sum_kernel(pred_ref, target_ref, out_ref, *,
                      alpha, gamma, n_valid, tile_elems, tps,
                      full_tiles, grid_tiles):
    c = pl.program_id(0)          # split (core) index
    i = pl.program_id(1)          # tile index within split
    g = c * tps + i               # global tile index (int32-safe: see wrapper assert)
    tr = pred_ref.shape[0]        # tile rows (multiple of the sublane packing)

    # The output block (8,128) is the per-split accumulator: its block index
    # depends only on c, so it stays resident across the inner "arbitrary" axis.
    @pl.when(i == 0)
    def _():
        out_ref[...] = jnp.zeros_like(out_ref)

    p = pred_ref[...].astype(jnp.float32)   # (tr, 128)
    t = target_ref[...].astype(jnp.float32)

    # Clamp so saturated probabilities never hit log(0); log1p(-p) keeps
    # precision for p near 0 at the same EUP cost as log(1-p).
    p = jnp.clip(p, EPS, 1.0 - EPS)
    log_p = jnp.log(p)
    log_1mp = jnp.log1p(-p)
    one_m_p = 1.0 - p

    # gamma is a Python int -> integer_pow -> VPU multiplies (no EUP exp/log).
    pos = (one_m_p ** gamma) * (t * log_p)
    neg = (p ** gamma) * ((1.0 - t) * log_1mp)
    loss = (-alpha) * pos - (1.0 - alpha) * neg

    def _accum(x):
        # Sublane-group partial reduction: pure vreg-wise VPU adds (no XLU).
        out_ref[...] += jnp.sum(x.reshape(tr // 8, 8, LANES), axis=0)

    if full_tiles == grid_tiles:
        # Statically known: every grid tile is fully valid -> no mask anywhere.
        _accum(loss)
    else:
        @pl.when(g < full_tiles)
        def _():                      # fully-valid tiles: unmasked fast path
            _accum(loss)

        @pl.when(g >= full_tiles)
        def _():                      # partial tail tile / ghost tiles only
            rem = n_valid - g * tile_elems        # valid elements in this tile (may be <= 0)
            row_idx = lax.broadcasted_iota(jnp.int32, loss.shape, 0)
            lane_idx = lax.broadcasted_iota(jnp.int32, loss.shape, 1)
            local_idx = row_idx * LANES + lane_idx
            # Mask is the last op before accumulation: also scrubs any NaN bit
            # patterns read from out-of-bounds (unspecified) block regions.
            _accum(jnp.where(local_idx < rem, loss, 0.0))


def focal_loss(pred, target, *, gamma=2, alpha=0.25, reduction="mean",
               tile_rows=2048):
    """Focal loss matching the PyTorch module's forward (mean/sum reduction)."""
    assert pred.shape == target.shape
    n = int(pred.size)
    assert n > 0

    if reduction == "mean":
        scale = 1.0 / n
    elif reduction == "sum":
        scale = 1.0
    else:
        # TODO(synk): reduction='none' (per-element loss output) not implemented.
        raise NotImplementedError("only 'mean' and 'sum' reductions supported")

    # Keep f32/bf16 inputs in their native dtype (kernel upcasts); anything
    # else (f64, ints, bool) is cast to f32 in the wrapper.
    def _prep(x):
        if x.dtype == jnp.float32 or x.dtype == jnp.bfloat16:
            return x
        return x.astype(jnp.float32)

    pred = _prep(pred)
    target = _prep(target)
    sub = max(_sublane_multiple(pred.dtype), _sublane_multiple(target.dtype))

    # Lane-dense layout: (rows, 128). Only pad to a lane multiple (<=127 elems);
    # no padding at all when n % 128 == 0.
    rows = _cdiv(n, LANES)
    tr = _round_up(max(min(tile_rows, rows), 1), sub)      # tile rows
    tile_elems = tr * LANES
    tiles = _cdiv(rows, tr)                                 # real tiles (last may be ragged)
    num_splits = NUM_SPLITS if tiles >= 2 else 1
    tps = _cdiv(tiles, num_splits)                          # tiles per split
    grid_tiles = num_splits * tps                           # includes ghost tiles if tiles is odd
    full_tiles = n // tile_elems                            # tiles with zero padding/OOB

    # int32 index-math guard (g * tile_elems and n must fit in int32).
    assert n + 2 * tile_elems < 2 ** 31, "input too large for int32 tile index math"

    def _to2d(x):
        x = jnp.ravel(x)
        pad = rows * LANES - n
        if pad:
            x = jnp.pad(x, (0, pad), constant_values=0)     # masked exactly in-kernel
        return x.reshape(rows, LANES)

    p2d = _to2d(pred)
    t2d = _to2d(target)

    if grid_tiles == tiles:
        in_map = lambda c, i: (c * tps + i, 0)
    else:
        # Ghost grid points (only when tiles is odd) re-read the last real tile
        # and are fully masked in-kernel (rem <= 0).
        in_map = lambda c, i: (jnp.minimum(c * tps + i, tiles - 1), 0)

    kernel = functools.partial(
        _focal_sum_kernel,
        alpha=float(alpha), gamma=int(gamma), n_valid=n, tile_elems=tile_elems,
        tps=tps, full_tiles=full_tiles, grid_tiles=grid_tiles)

    out = pl.pallas_call(
        kernel,
        out_shape=jax.ShapeDtypeStruct((num_splits * 8, LANES), jnp.float32),
        grid=(num_splits, tps),
        in_specs=[
            pl.BlockSpec((tr, LANES), in_map),
            pl.BlockSpec((tr, LANES), in_map),
        ],
        out_specs=pl.BlockSpec((8, LANES), lambda c, i: (c, 0)),
        compiler_params=pltpu.CompilerParams(
            # outer axis sharded across TensorCores on v7x; inner axis carries
            # the per-split accumulator.
            dimension_semantics=("parallel", "arbitrary"),
        ),
    )(p2d, t2d)

    # Single tiny cross-lane reduction + 1/N scale, once, in the wrapper.
    total = jnp.sum(out)
    if scale != 1.0:
        total = total * jnp.float32(scale)
    return total


def _reference(pred, target, gamma=2, alpha=0.25, reduction="mean"):
    # Pure-JAX mirror of the PyTorch forward.
    loss = (-alpha * (1.0 - pred) ** gamma * target * jnp.log(pred)
            - (1.0 - alpha) * pred ** gamma * (1.0 - target) * jnp.log(1.0 - pred))
    if reduction == "mean":
        return jnp.mean(loss)
    if reduction == "sum":
        return jnp.sum(loss)
    return loss


if __name__ == "__main__":
    key = jax.random.PRNGKey(0)
    k1, k2 = jax.random.split(key)

    # (batch=2, channels=4, spatial=16x16): probabilities strictly inside (0,1).
    shape = (2, 4, 16, 16)
    pred = jax.nn.sigmoid(jax.random.normal(k1, shape, dtype=jnp.float32))
    target = (jax.random.uniform(k2, shape) > 0.5).astype(jnp.float32)

    out = focal_loss(pred, target)
    jax.block_until_ready(out)
    ref = _reference(pred, target)
    assert jnp.allclose(out, ref, atol=1e-5, rtol=1e-5), (out, ref)

    # Ragged tail + 2-way split + tail masking (1155 elems -> 10 rows -> 2 tiles of 8).
    shape2 = (3, 5, 7, 11)
    p2 = jax.nn.sigmoid(jax.random.normal(k1, shape2, dtype=jnp.float32))
    t2 = (jax.random.uniform(k2, shape2) > 0.5).astype(jnp.float32)
    out2 = focal_loss(p2, t2, tile_rows=8)
    jax.block_until_ready(out2)
    ref2 = _reference(p2, t2)
    assert jnp.allclose(out2, ref2, atol=1e-5, rtol=1e-5), (out2, ref2)

    # Odd tile count -> ghost grid point on the second split (clamped + fully masked).
    shape3 = (2, 4, 16, 40)   # 5120 elems -> 40 rows -> 5 tiles of 8 -> grid (2, 3)
    p3 = jax.nn.sigmoid(jax.random.normal(k1, shape3, dtype=jnp.float32))
    t3 = (jax.random.uniform(k2, shape3) > 0.5).astype(jnp.float32)
    out3 = focal_loss(p3, t3, tile_rows=8)
    jax.block_until_ready(out3)
    ref3 = _reference(p3, t3)
    assert jnp.allclose(out3, ref3, atol=1e-5, rtol=1e-5), (out3, ref3)

    # 'sum' reduction path.
    out4 = focal_loss(pred, target, reduction="sum")
    jax.block_until_ready(out4)
    ref4 = _reference(pred, target, reduction="sum")
    assert jnp.allclose(out4, ref4, atol=1e-4, rtol=1e-5), (out4, ref4)

    print("KERNEL_OK")
</pallas_src>

<mosaic_0001>
module attributes {stable_mosaic.version = 11 : i64} {
  func.func @_focal_sum_kernel(%arg0: i32, %arg1: i32, %arg2: memref<16x128xf32, #tpu.memory_space<vmem>>, %arg3: memref<16x128xf32, #tpu.memory_space<vmem>>, %arg4: memref<8x128xf32, #tpu.memory_space<vmem>>) attributes {dimension_semantics = [#tpu.dimension_semantics<parallel>, #tpu.dimension_semantics<arbitrary>], iteration_bounds = array<i64: 1, 1>, scalar_prefetch = 0 : i64, scratch_operands = 0 : i64, tpu.core_type = #tpu.core_type<tc>, window_params = [{transform_indices = @transform_0, window_bounds = array<i64: 16, 128>}, {transform_indices = @transform_1, window_bounds = array<i64: 16, 128>}, {transform_indices = @transform_2, window_bounds = array<i64: 8, 128>}]} {
    %c0_i32 = arith.constant 0 : i32
    %0 = arith.cmpi eq, %arg1, %c0_i32 : i32
    %1 = arith.extui %0 : i1 to i32
    %c0_i32_0 = arith.constant 0 : i32
    %2 = arith.cmpi ne, %1, %c0_i32_0 : i32
    scf.if %2 {
      %cst_15 = arith.constant 0.000000e+00 : f32
      %33 = vector.broadcast %cst_15 : f32 to vector<8x128xf32>
      %c0_16 = arith.constant 0 : index
      %c0_17 = arith.constant 0 : index
      %34 = vector.load %arg4[%c0_16, %c0_17] : memref<8x128xf32, #tpu.memory_space<vmem>>, vector<8x128xf32>
      tpu.vector_store %arg4[%c0_16, %c0_17], %33 {strides = array<i32>} : memref<8x128xf32, #tpu.memory_space<vmem>>, vector<8x128xf32>,
    } else {
    }
    %c0 = arith.constant 0 : index
    %c0_1 = arith.constant 0 : index
    %3 = vector.load %arg2[%c0, %c0_1] : memref<16x128xf32, #tpu.memory_space<vmem>>, vector<16x128xf32>
    %c0_2 = arith.constant 0 : index
    %c0_3 = arith.constant 0 : index
    %4 = vector.load %arg3[%c0_2, %c0_3] : memref<16x128xf32, #tpu.memory_space<vmem>>, vector<16x128xf32>
    %cst = arith.constant 1.000000e-07 : f32
    %cst_4 = arith.constant 0.99999988 : f32
    %5 = vector.broadcast %cst : f32 to vector<16x128xf32>
    %6 = arith.maximumf %5, %3 : vector<16x128xf32>
    %7 = vector.broadcast %cst_4 : f32 to vector<16x128xf32>
    %8 = arith.minimumf %7, %6 : vector<16x128xf32>
    %9 = math.log %8 : vector<16x128xf32>
    %cst_5 = arith.constant 0.000000e+00 : f32
    %10 = vector.broadcast %cst_5 : f32 to vector<16x128xf32>
    %11 = arith.subf %10, %8 : vector<16x128xf32>
    %12 = math.log1p %11 : vector<16x128xf32>
    %cst_6 = arith.constant 1.000000e+00 : f32
    %13 = vector.broadcast %cst_6 : f32 to vector<16x128xf32>
    %14 = arith.subf %13, %8 : vector<16x128xf32>
    %15 = arith.mulf %14, %14 : vector<16x128xf32>
    %16 = arith.mulf %4, %9 : vector<16x128xf32>
    %17 = arith.mulf %15, %16 : vector<16x128xf32>
    %18 = arith.mulf %8, %8 : vector<16x128xf32>
    %cst_7 = arith.constant 1.000000e+00 : f32
    %19 = vector.broadcast %cst_7 : f32 to vector<16x128xf32>
    %20 = arith.subf %19, %4 : vector<16x128xf32>
    %21 = arith.mulf %20, %12 : vector<16x128xf32>
    %22 = arith.mulf %18, %21 : vector<16x128xf32>
    %cst_8 = arith.constant -2.500000e-01 : f32
    %23 = vector.broadcast %cst_8 : f32 to vector<16x128xf32>
    %24 = arith.mulf %23, %17 : vector<16x128xf32>
    %cst_9 = arith.constant 7.500000e-01 : f32
    %25 = vector.broadcast %cst_9 : f32 to vector<16x128xf32>
    %26 = arith.mulf %25, %22 : vector<16x128xf32>
    %27 = arith.subf %24, %26 : vector<16x128xf32>
    %c0_10 = arith.constant 0 : index
    %c0_11 = arith.constant 0 : index
    %28 = vector.load %arg4[%c0_10, %c0_11] : memref<8x128xf32, #tpu.memory_space<vmem>>, vector<8x128xf32>
    %29 = vector.shape_cast %27 : vector<16x128xf32> to vector<2x8x128xf32>
    %cst_12 = arith.constant dense<0.000000e+00> : vector<8x128xf32>
    %30 = vector.multi_reduction <add>, %29, %cst_12 [0] : vector<2x8x128xf32> to vector<8x128xf32>
    %31 = arith.addf %28, %30 : vector<8x128xf32>
    %c0_13 = arith.constant 0 : index
    %c0_14 = arith.constant 0 : index
    %32 = vector.load %arg4[%c0_13, %c0_14] : memref<8x128xf32, #tpu.memory_space<vmem>>, vector<8x128xf32>
    tpu.vector_store %arg4[%c0_13, %c0_14], %31 {strides = array<i32>} : memref<8x128xf32, #tpu.memory_space<vmem>>, vector<8x128xf32>,
    return
  }
  func.func @transform_0(%arg0: i32, %arg1: i32) -> (i32, i32) {
    %c1_i32 = arith.constant 1 : i32
    %0 = arith.muli %arg0, %c1_i32 : i32
    %1 = arith.addi %0, %arg1 : i32
    %c0_i32 = arith.constant 0 : i32
    %c0_i32_0 = arith.constant 0 : i32
    return %1, %c0_i32 : i32, i32
  }
  func.func @transform_1(%arg0: i32, %arg1: i32) -> (i32, i32) {
    %c1_i32 = arith.constant 1 : i32
    %0 = arith.muli %arg0, %c1_i32 : i32
    %1 = arith.addi %0, %arg1 : i32
    %c0_i32 = arith.constant 0 : i32
    %c0_i32_0 = arith.constant 0 : i32
    return %1, %c0_i32 : i32, i32
  }
  func.func @transform_2(%arg0: i32, %arg1: i32) -> (i32, i32) {
    %c0_i32 = arith.constant 0 : i32
    %c0_i32_0 = arith.constant 0 : i32
    return %arg0, %c0_i32 : i32, i32
  }
}

</mosaic_0001>

<bundles_post_ra>
// kernel: tpu_custom_call.1
= control target key start
LH: loop header
LB: loop body
LE: loop exit
PB: predicated region body
PF: predicated region fallthrough
CT: control target
= control target key end

     0   :  { %7 = vsyncpa [#allocation3], 0  ;;  %s273_s0 = inlined_call_operand.hbm [shape: f32[16,128], index: 0, kind: input, shape index: {}]   ;;  %s274_s1 = inlined_call_operand.hbm [shape: f32[16,128], index: 1, kind: input, shape index: {}]   ;;  %s275_s2 = inlined_call_operand.hbm [shape: f32[8,128], index: 2, kind: output, shape index: {}]  }
   0x1   :  { %8 = vsyncpa [#allocation6], 0 }
   0x2   :  { %9 = vsyncpa [#allocation4], 0  ;;  %s217_s9 = smov [#allocation2]   ;;  %s145_s13 = scalar_lea.hbm %s273_s0, 256 }
   0x3   :  { %s19_s10 = sshll.u32 %s217_s9, 4  ;;  %p146_p0 = scmp.ne.s32.totalorder %s273_s0, %s145_s13  ;;  %s20_s10 = int_to_ptr.vmem [resolvable:$true] %s19_s10 }
   0x4   :  { %p149_p1 = scmp.lt.u32.totalorder %s145_s13, %s273_s0 }
   0x6   :  { %p151_p2 = pnand %p149_p1, %p146_p0 }
   0x8   :  { %154 = shalt.err (!%p151_p2)
}
   0x9   :  { %s155_s18 = scalar_lea.vmem %s20_s10, 256  ;;  %p160_p4 = scmp.lt.s32.totalorder %s20_s10, %s20_s10 }
   0xa   :  { %p156_p3 = scmp.ne.s32.totalorder %s20_s10, %s155_s18  ;;  %p161_p5 = scmp.lt.s32.totalorder %s155_s18, %s155_s18 }
   0xc   :  { %p162_p6 = por %p161_p5, %p160_p4 }
   0xe   :  { %p163_p7 = pnand %p162_p6, %p156_p3 }
  0x10   :  { %166 = shalt.err (!%p163_p7)
}
  0x11   :  { %s218_s19 = smov 128   ;;  %s219_s20 = smov 8  }
  0x12   :  { %25 = dma.hbm_to_vmem [thread:$0]  %s273_s0, 256, %s20_s10, [#allocation3], %s218_s19, %s218_s19, %s219_s20  }
  0x13   :  { %s220_s23 = smov [#allocation5]   ;;  %s167_s27 = scalar_lea.hbm %s274_s1, 256 }
  0x14   :  { %s35_s24 = sshll.u32 %s220_s23, 4  ;;  %p168_p8 = scmp.ne.s32.totalorder %s274_s1, %s167_s27  ;;  %s36_s24 = int_to_ptr.vmem [resolvable:$true] %s35_s24 }
  0x15   :  { %p171_p9 = scmp.lt.u32.totalorder %s167_s27, %s274_s1 }
  0x17   :  { %p173_p10 = pnand %p171_p9, %p168_p8 }
  0x19   :  { %176 = shalt.err (!%p173_p10)
}
  0x1a   :  { %s177_s4 = scalar_lea.vmem %s36_s24, 256  ;;  %p182_p12 = scmp.lt.s32.totalorder %s36_s24, %s36_s24 }
  0x1b   :  { %p178_p11 = scmp.ne.s32.totalorder %s36_s24, %s177_s4  ;;  %p183_p13 = scmp.lt.s32.totalorder %s177_s4, %s177_s4 }
  0x1d   :  { %p184_p0 = por %p183_p13, %p182_p12 }
  0x1f   :  { %p185_p1 = pnand %p184_p0, %p178_p11 }
  0x21   :  { %188 = shalt.err (!%p185_p1)
}
  0x22   :  { %41 = dma.hbm_to_vmem [thread:$0]  %s274_s1, 256, %s36_s24, [#allocation6], %s218_s19, %s218_s19, %s219_s20  }
  0x23   :  { %211 = dma.done.wait [#allocation3], 256  }
  0x24   :  { %212 = vsyncadd [#allocation3], 4294967040 }
  0x25   :  { %213 = dma.done.wait [#allocation6], 256  }
  0x26   :  { %214 = vsyncadd [#allocation6], 4294967040  ;;  %v57_v0 = vld [vmem:[#allocation2] sm:$0xff]  ;;  %v58_v1 = vld [vmem:[#allocation2 + $0x8] sm:$0xff]  ;;  %s221_s1 = smov [#allocation7]  }
  0x27   :  { %v61_v2 = vmax.f32 %v57_v0, 1e-07  ;;  %v62_v3 = vmax.f32 %v58_v1, 1e-07  ;;  %v59_v19 = vld [vmem:[#allocation5] sm:$0xff]  ;;  %v60_v22 = vld [vmem:[#allocation5 + $0x8] sm:$0xff] }
  0x28   :  { %v99_v31 = vsub.f32 1.0, %v59_v19  ;;  %v100_v34 = vsub.f32 1.0, %v60_v22  ;;  %s121_s6 = sshll.u32 %s221_s1, 4  ;;  %s122_s6 = int_to_ptr.vmem [resolvable:$true] %s121_s6 }
  0x29   :  { %v63_v4 = vmin.f32 %v61_v2, 0.9999999  ;;  %v64_v5 = vmin.f32 %v62_v3, 0.9999999  ;;  %s189_s7 = scalar_lea.vmem %s122_s6, 128  ;;  %p194_p3 = scmp.lt.s32.totalorder %s122_s6, %s122_s6 }
  0x2a   :  { %p190_p2 = scmp.ne.s32.totalorder %s122_s6, %s189_s7  ;;  %p195_p4 = scmp.lt.s32.totalorder %s189_s7, %s189_s7 }
  0x2b   :  { %137 = vlog2.f32 %v63_v4  ;;  %v69_v6 = vsub.f32 0.0, %v63_v4  ;;  %v70_v7 = vsub.f32 0.0, %v64_v5  ;;  %v89_v12 = vsub.f32 1.0, %v63_v4 }
  0x2c   :  { %139 = vlog2.f32 %v64_v5  ;;  %v90_v14 = vsub.f32 1.0, %v64_v5  ;;  %v97_v37 = vmul.f32 %v63_v4, %v63_v4  ;;  %v98_v40 = vmul.f32 %v64_v5, %v64_v5  ;;  %p196_p5 = por %p195_p4, %p194_p3 }
  0x2d   :  { %v71_v8 = vadd.f32 1.0, %v69_v6  ;;  %v80_v9 = vadd.f32 1.0, %v70_v7  ;;  %v74_v10 = vmul.f32 -0.5, %v69_v6  ;;  %v83_v11 = vmul.f32 -0.5, %v70_v7 }
  0x2e   :  { %v77_v16 = vand.u32 2147483647, %v69_v6  ;;  %v86_v21 = vand.u32 2147483647, %v70_v7  ;;  %v91_v24 = vmul.f32 %v89_v12, %v89_v12  ;;  %v92_v26 = vmul.f32 %v90_v14, %v90_v14  ;;  %p197_p6 = pnand %p196_p5, %p190_p2 }
  0x2f   :  { %141 = vlog2.f32 %v71_v8  ;;  %v75_v13 = vadd.f32 1.0, %v74_v10  ;;  %v84_v17 = vadd.f32 1.0, %v83_v11 }
  0x30   :  { %143 = vlog2.f32 %v80_v9  ;;  %vm78_vm0 = vcmp.lt.f32.partialorder %v77_v16, 0.0004427343  ;;  %vm87_vm1 = vcmp.lt.f32.partialorder %v86_v21, 0.0004427343 }
  0x31   :  { %v76_v25 = vmul.f32 %v75_v13, %v69_v6  ;;  %v85_v29 = vmul.f32 %v84_v17, %v70_v7 }
  0x35   :  { %v138_v15 = vpop.eup %137 }
  0x36   :  { %v140_v18 = vpop.eup %139  ;;  %v66_v20 = vmul.f32 0.6931472, %v138_v15 }
  0x37   :  { %v68_v23 = vmul.f32 0.6931472, %v140_v18 }
  0x38   :  { %v93_v27 = vmul.f32 %v66_v20, %v59_v19 }
  0x39   :  { %v142_v28 = vpop.eup %141  ;;  %v94_v30 = vmul.f32 %v68_v23, %v60_v22 }
  0x3a   :  { %v144_v32 = vpop.eup %143  ;;  %v73_v33 = vmul.f32 0.6931472, %v142_v28  ;;  %v95_v36 = vmul.f32 %v93_v27, %v91_v24 }
  0x3b   :  { %v82_v35 = vmul.f32 0.6931472, %v144_v32  ;;  %v96_v39 = vmul.f32 %v94_v30, %v92_v26 }
  0x3c   :  { %v79_v38 = vsel %vm78_vm0, %v76_v25, %v73_v33  ;;  %v105_v45 = vmul.f32 -0.25, %v95_v36 }
  0x3d   :  { %v88_v41 = vsel %vm87_vm1, %v85_v29, %v82_v35  ;;  %v101_v42 = vmul.f32 %v99_v31, %v79_v38  ;;  %v106_v47 = vmul.f32 -0.25, %v96_v39 }
  0x3e   :  { %v102_v43 = vmul.f32 %v100_v34, %v88_v41 }
  0x3f   :  { %v103_v44 = vmul.f32 %v101_v42, %v97_v37 }
  0x40   :  { %v104_v46 = vmul.f32 %v102_v43, %v98_v40 }
  0x41   :  { %v107_v48 = vmul.f32 0.75, %v103_v44 }
  0x42   :  { %v108_v49 = vmul.f32 0.75, %v104_v46 }
  0x43   :  { %v109_v50 = vsub.f32 %v105_v45, %v107_v48 }
  0x44   :  { %v110_v51 = vsub.f32 %v106_v47, %v108_v49 }
  0x46   :  { %v112_v52 = vadd.f32 %v110_v51, %v109_v50 }
  0x48   :  { %114 = vst [vmem:[#allocation7] sm:$0xff] %v112_v52 }
  0x49   :  { %200 = shalt.err (!%p197_p6)
}
  0x4a   :  { %s201_s10 = scalar_lea.hbm %s275_s2, 128 }
  0x4b   :  { %p202_p7 = scmp.ne.s32.totalorder %s275_s2, %s201_s10  ;;  %p205_p8 = scmp.lt.u32.totalorder %s201_s10, %s275_s2 }
  0x4d   :  { %p207_p9 = pnand %p205_p8, %p202_p7 }
  0x4f   :  { %210 = shalt.err (!%p207_p9)
}
  0x50   :  { %124 = dma.vmem_to_hbm [thread:$0]  %s122_s6, 128, %s275_s2, [#allocation4]  }
  0x51   :  { %215 = dma.done.wait [#allocation4], 128  }
  0x52   :  { %216 = vsyncadd [#allocation4], 4294967168 }
  0x53   :  { %128 = vsyncpa [#allocation3], 1 }
  0x54   :  { %129 = vsyncpa [#allocation6], 1 }
  0x55   :  { %130 = vsyncpa [#allocation4], 1 }

</bundles_post_ra>
